<compile_context>
chip_gen: v6e
topology: v6e:2x2x1
jax: 0.10.0
libtpu: 0.0.40
codegen_flags: <defaults>
</compile_context>

<pallas_src>
import math
import jax
import jax.numpy as jnp
from jax.experimental import pallas as pl
from jax.experimental.pallas import tpu as pltpu


def _round_hidden(hidden_size: int, multiple_of: int, ffn_dim_multiplier=None) -> int:
    hidden_size = int(2 * hidden_size / 3)
    if ffn_dim_multiplier is not None:
        hidden_size = int(ffn_dim_multiplier * hidden_size)
    hidden_size = multiple_of * ((hidden_size + multiple_of - 1) // multiple_of)
    return hidden_size


def _round_up(a: int, b: int) -> int:
    return ((a + b - 1) // b) * b


def ffn_kernel(x_ref, wu_ref, bu_ref, wg_ref, bg_ref, w2_ref, b2_ref, o_ref):
    # x_ref:  (TM, Dp)   token tile (streamed)
    # wu_ref: (Dp, Hp)   up-projection   (resident)
    # wg_ref: (Dp, Hp)   gate-projection (resident)
    # w2_ref: (Hp, Dp)   down-projection (resident)
    # bu/bg:  (1, Hp) f32, b2: (1, Dp) f32
    x = x_ref[...]  # native dtype straight into the MXU, f32 accumulation
    up = jnp.dot(x, wu_ref[...], preferred_element_type=jnp.float32) + bu_ref[...]
    gate = jnp.dot(x, wg_ref[...], preferred_element_type=jnp.float32) + bg_ref[...]
    # silu(up) * gate; sigmoid lands on the EUP slot (free in a matmul-bound kernel).
    act = (up * jax.nn.sigmoid(up) * gate).astype(x_ref.dtype)
    out = jnp.dot(act, w2_ref[...], preferred_element_type=jnp.float32) + b2_ref[...]
    o_ref[...] = out.astype(o_ref.dtype)


def feedforward_pallas(x, w1, b1, w2, b2, *, tm=256):
    """SwiGLU feed-forward.

    x : (..., D)
    w1: (2H, D)  (PyTorch nn.Linear weight layout),  b1: (2H,)
    w2: (D, H),                                      b2: (D,)
    """
    orig_shape = x.shape
    D = orig_shape[-1]
    M = math.prod(orig_shape[:-1])
    H2 = w1.shape[0]
    H = H2 // 2
    assert w1.shape == (2 * H, D) and w2.shape == (D, H)

    # Lane-dense padded feature dims.
    Dp = _round_up(D, 128)
    Hp = _round_up(H, 128)

    # Token-dim tiling (second-to-last dim must be a multiple of 8).
    Mp = _round_up(max(M, 8), 8)
    TM = min(tm, Mp)
    grid_m = pl.cdiv(Mp, TM)
    Mp = grid_m * TM

    dtype = x.dtype
    dsize = jnp.dtype(dtype).itemsize

    # ---- host-side layout prep (zero padding is neutral for this computation) ----
    xf = jnp.zeros((Mp, Dp), dtype=dtype).at[:M, :D].set(x.reshape(M, D))

    w_up_t = jnp.zeros((Dp, Hp), dtype=dtype).at[:D, :H].set(w1[:H, :].T.astype(dtype))
    w_gate_t = jnp.zeros((Dp, Hp), dtype=dtype).at[:D, :H].set(w1[H:, :].T.astype(dtype))
    w2_t = jnp.zeros((Hp, Dp), dtype=dtype).at[:H, :D].set(w2.T.astype(dtype))

    b_up = jnp.zeros((1, Hp), dtype=jnp.float32).at[0, :H].set(b1[:H].astype(jnp.float32))
    b_gate = jnp.zeros((1, Hp), dtype=jnp.float32).at[0, :H].set(b1[H:].astype(jnp.float32))
    b2_p = jnp.zeros((1, Dp), dtype=jnp.float32).at[0, :D].set(b2.astype(jnp.float32))

    # ---- VMEM budget (resident weights + double-buffered io tiles + intermediates) ----
    weight_bytes = (2 * Dp * Hp + Hp * Dp) * dsize + (2 * Hp + Dp) * 4
    io_bytes = 2 * 2 * TM * Dp * dsize                 # x/out, double buffered
    inter_bytes = 3 * TM * Hp * 4 + TM * Dp * 4        # up/gate/act + f32 out
    est_bytes = weight_bytes + io_bytes + inter_bytes
    vmem_limit = int(min(max(2 * est_bytes, 32 * 1024 * 1024), 64 * 1024 * 1024))

    cost = pl.CostEstimate(
        flops=2 * Mp * Dp * (2 * Hp) + 2 * Mp * Hp * Dp,
        transcendentals=Mp * Hp,
        bytes_accessed=(xf.size + w_up_t.size + w_gate_t.size + w2_t.size) * dsize
        + (b_up.size + b_gate.size + b2_p.size) * 4
        + Mp * Dp * dsize,
    )

    out = pl.pallas_call(
        ffn_kernel,
        out_shape=jax.ShapeDtypeStruct((Mp, Dp), dtype),
        grid_spec=pl.GridSpec(
            grid=(grid_m,),
            in_specs=[
                pl.BlockSpec((TM, Dp), lambda i: (i, 0)),   # x tile (streamed)
                pl.BlockSpec((Dp, Hp), lambda i: (0, 0)),   # w_up (resident)
                pl.BlockSpec((1, Hp), lambda i: (0, 0)),    # b_up
                pl.BlockSpec((Dp, Hp), lambda i: (0, 0)),   # w_gate (resident)
                pl.BlockSpec((1, Hp), lambda i: (0, 0)),    # b_gate
                pl.BlockSpec((Hp, Dp), lambda i: (0, 0)),   # w2 (resident)
                pl.BlockSpec((1, Dp), lambda i: (0, 0)),    # b2
            ],
            out_specs=pl.BlockSpec((TM, Dp), lambda i: (i, 0)),
        ),
        compiler_params=pltpu.CompilerParams(
            dimension_semantics=("parallel",),
            vmem_limit_bytes=vmem_limit,
        ),
        cost_estimate=cost,
    )(xf, w_up_t, b_up, w_gate_t, b_gate, w2_t, b2_p)

    return out[:M, :D].reshape(orig_shape)
    # TODO(synk): if D/H grow so resident weights exceed the VMEM budget, add a
    # grid axis over H with an accumulator scratch (pl.when init/finalize).


def reference_jax(x, w1, b1, w2, b2):
    h = jnp.dot(x, w1.T) + b1
    H = h.shape[-1] // 2
    xh, gate = h[..., :H], h[..., H:]
    act = xh * jax.nn.sigmoid(xh) * gate
    return jnp.dot(act, w2.T) + b2


if __name__ == "__main__":
    # Module config consistent with the PyTorch __init__ math.
    in_features = 32
    hidden_size_arg = 48
    multiple_of = 32
    hidden_dim = _round_hidden(hidden_size_arg, multiple_of)   # = 32

    batch, seq = 2, 8

    key = jax.random.PRNGKey(0)
    kx, kw1, kb1, kw2, kb2 = jax.random.split(key, 5)

    x = jax.random.normal(kx, (batch, seq, in_features), dtype=jnp.float32)

    # PyTorch nn.Linear layouts: w1: (2*hidden, in), w2: (in, hidden).
    w1 = jax.random.normal(kw1, (2 * hidden_dim, in_features), dtype=jnp.float32) * 0.05
    b1 = jax.random.normal(kb1, (2 * hidden_dim,), dtype=jnp.float32) * 0.05
    w2 = jax.random.normal(kw2, (in_features, hidden_dim), dtype=jnp.float32) * 0.05
    b2 = jax.random.normal(kb2, (in_features,), dtype=jnp.float32) * 0.05

    out = feedforward_pallas(x, w1, b1, w2, b2)
    out = jax.block_until_ready(out)

    ref = reference_jax(x, w1, b1, w2, b2)
    assert out.shape == (batch, seq, in_features)
    assert jnp.allclose(out, ref, atol=1e-4, rtol=1e-4), "mismatch vs reference"

    print("KERNEL_OK")
</pallas_src>

<mosaic_0001>
module attributes {stable_mosaic.version = 11 : i64} {
  func.func @ffn_kernel(%arg0: i32, %arg1: memref<16x128xf32, #tpu.memory_space<vmem>>, %arg2: memref<128x128xf32, #tpu.memory_space<vmem>>, %arg3: memref<1x128xf32, #tpu.memory_space<vmem>>, %arg4: memref<128x128xf32, #tpu.memory_space<vmem>>, %arg5: memref<1x128xf32, #tpu.memory_space<vmem>>, %arg6: memref<128x128xf32, #tpu.memory_space<vmem>>, %arg7: memref<1x128xf32, #tpu.memory_space<vmem>>, %arg8: memref<16x128xf32, #tpu.memory_space<vmem>>) attributes {dimension_semantics = [#tpu.dimension_semantics<parallel>], iteration_bounds = array<i64: 1>, scalar_prefetch = 0 : i64, scratch_operands = 0 : i64, tpu.core_type = #tpu.core_type<tc>, window_params = [{transform_indices = @transform_0, window_bounds = array<i64: 16, 128>}, {pipeline_mode = #tpu.pipeline_mode<synchronous>, transform_indices = @transform_1, window_bounds = array<i64: 128, 128>}, {pipeline_mode = #tpu.pipeline_mode<synchronous>, transform_indices = @transform_2, window_bounds = array<i64: 1, 128>}, {pipeline_mode = #tpu.pipeline_mode<synchronous>, transform_indices = @transform_3, window_bounds = array<i64: 128, 128>}, {pipeline_mode = #tpu.pipeline_mode<synchronous>, transform_indices = @transform_4, window_bounds = array<i64: 1, 128>}, {pipeline_mode = #tpu.pipeline_mode<synchronous>, transform_indices = @transform_5, window_bounds = array<i64: 128, 128>}, {pipeline_mode = #tpu.pipeline_mode<synchronous>, transform_indices = @transform_6, window_bounds = array<i64: 1, 128>}, {transform_indices = @transform_7, window_bounds = array<i64: 16, 128>}]} {
    %c0 = arith.constant 0 : index
    %c0_0 = arith.constant 0 : index
    %0 = vector.load %arg1[%c0, %c0_0] : memref<16x128xf32, #tpu.memory_space<vmem>>, vector<16x128xf32>
    %c0_1 = arith.constant 0 : index
    %c0_2 = arith.constant 0 : index
    %1 = vector.load %arg2[%c0_1, %c0_2] : memref<128x128xf32, #tpu.memory_space<vmem>>, vector<128x128xf32>
    %cst = arith.constant dense<0.000000e+00> : vector<16x128xf32>
    %2 = tpu.matmul %0, %1, %cst {dimension_numbers = #tpu.dot_dimension_numbers<[1], [0], [0], [1], [0, 0, 1, 1], [], []>} : vector<16x128xf32>, vector<128x128xf32>, vector<16x128xf32> -> vector<16x128xf32>
    %c0_3 = arith.constant 0 : index
    %c0_4 = arith.constant 0 : index
    %3 = vector.load %arg3[%c0_3, %c0_4] : memref<1x128xf32, #tpu.memory_space<vmem>>, vector<1x128xf32>
    %4 = vector.broadcast %3 : vector<1x128xf32> to vector<16x128xf32>
    %5 = arith.addf %2, %4 : vector<16x128xf32>
    %c0_5 = arith.constant 0 : index
    %c0_6 = arith.constant 0 : index
    %6 = vector.load %arg4[%c0_5, %c0_6] : memref<128x128xf32, #tpu.memory_space<vmem>>, vector<128x128xf32>
    %cst_7 = arith.constant dense<0.000000e+00> : vector<16x128xf32>
    %7 = tpu.matmul %0, %6, %cst_7 {dimension_numbers = #tpu.dot_dimension_numbers<[1], [0], [0], [1], [0, 0, 1, 1], [], []>} : vector<16x128xf32>, vector<128x128xf32>, vector<16x128xf32> -> vector<16x128xf32>
    %c0_8 = arith.constant 0 : index
    %c0_9 = arith.constant 0 : index
    %8 = vector.load %arg5[%c0_8, %c0_9] : memref<1x128xf32, #tpu.memory_space<vmem>>, vector<1x128xf32>
    %9 = vector.broadcast %8 : vector<1x128xf32> to vector<16x128xf32>
    %10 = arith.addf %7, %9 : vector<16x128xf32>
    %11 = arith.negf %5 : vector<16x128xf32>
    %12 = math.exp %11 : vector<16x128xf32>
    %cst_10 = arith.constant 1.000000e+00 : f32
    %13 = vector.broadcast %cst_10 : f32 to vector<16x128xf32>
    %14 = arith.addf %13, %12 : vector<16x128xf32>
    %15 = arith.divf %13, %14 : vector<16x128xf32>
    %16 = arith.mulf %5, %15 : vector<16x128xf32>
    %17 = arith.mulf %16, %10 : vector<16x128xf32>
    %c0_11 = arith.constant 0 : index
    %c0_12 = arith.constant 0 : index
    %18 = vector.load %arg6[%c0_11, %c0_12] : memref<128x128xf32, #tpu.memory_space<vmem>>, vector<128x128xf32>
    %cst_13 = arith.constant dense<0.000000e+00> : vector<16x128xf32>
    %19 = tpu.matmul %17, %18, %cst_13 {dimension_numbers = #tpu.dot_dimension_numbers<[1], [0], [0], [1], [0, 0, 1, 1], [], []>} : vector<16x128xf32>, vector<128x128xf32>, vector<16x128xf32> -> vector<16x128xf32>
    %c0_14 = arith.constant 0 : index
    %c0_15 = arith.constant 0 : index
    %20 = vector.load %arg7[%c0_14, %c0_15] : memref<1x128xf32, #tpu.memory_space<vmem>>, vector<1x128xf32>
    %21 = vector.broadcast %20 : vector<1x128xf32> to vector<16x128xf32>
    %22 = arith.addf %19, %21 : vector<16x128xf32>
    %c0_16 = arith.constant 0 : index
    %c0_17 = arith.constant 0 : index
    %23 = vector.load %arg8[%c0_16, %c0_17] : memref<16x128xf32, #tpu.memory_space<vmem>>, vector<16x128xf32>
    tpu.vector_store %arg8[%c0_16, %c0_17], %22 {strides = array<i32>} : memref<16x128xf32, #tpu.memory_space<vmem>>, vector<16x128xf32>,
    return
  }
  func.func @transform_0(%arg0: i32) -> (i32, i32) {
    %c0_i32 = arith.constant 0 : i32
    %c0_i32_0 = arith.constant 0 : i32
    return %arg0, %c0_i32 : i32, i32
  }
  func.func @transform_1(%arg0: i32) -> (i32, i32) {
    %c0_i32 = arith.constant 0 : i32
    %c0_i32_0 = arith.constant 0 : i32
    %c0_i32_1 = arith.constant 0 : i32
    return %c0_i32, %c0_i32_0 : i32, i32
  }
  func.func @transform_2(%arg0: i32) -> (i32, i32) {
    %c0_i32 = arith.constant 0 : i32
    %c0_i32_0 = arith.constant 0 : i32
    %c0_i32_1 = arith.constant 0 : i32
    return %c0_i32, %c0_i32_0 : i32, i32
  }
  func.func @transform_3(%arg0: i32) -> (i32, i32) {
    %c0_i32 = arith.constant 0 : i32
    %c0_i32_0 = arith.constant 0 : i32
    %c0_i32_1 = arith.constant 0 : i32
    return %c0_i32, %c0_i32_0 : i32, i32
  }
  func.func @transform_4(%arg0: i32) -> (i32, i32) {
    %c0_i32 = arith.constant 0 : i32
    %c0_i32_0 = arith.constant 0 : i32
    %c0_i32_1 = arith.constant 0 : i32
    return %c0_i32, %c0_i32_0 : i32, i32
  }
  func.func @transform_5(%arg0: i32) -> (i32, i32) {
    %c0_i32 = arith.constant 0 : i32
    %c0_i32_0 = arith.constant 0 : i32
    %c0_i32_1 = arith.constant 0 : i32
    return %c0_i32, %c0_i32_0 : i32, i32
  }
  func.func @transform_6(%arg0: i32) -> (i32, i32) {
    %c0_i32 = arith.constant 0 : i32
    %c0_i32_0 = arith.constant 0 : i32
    %c0_i32_1 = arith.constant 0 : i32
    return %c0_i32, %c0_i32_0 : i32, i32
  }
  func.func @transform_7(%arg0: i32) -> (i32, i32) {
    %c0_i32 = arith.constant 0 : i32
    %c0_i32_0 = arith.constant 0 : i32
    return %arg0, %c0_i32 : i32, i32
  }
}

</mosaic_0001>

<bundles_post_ra>
// kernel: tpu_custom_call.1
= control target key start
LH: loop header
LB: loop body
LE: loop exit
PB: predicated region body
PF: predicated region fallthrough
CT: control target
= control target key end

     0   :  { %12 = vsyncpa [#allocation3], 0  ;;  %s792_s0 = inlined_call_operand.hbm [shape: f32[16,128], index: 0, kind: input, shape index: {}]   ;;  %s793_s1 = inlined_call_operand.hbm [shape: f32[128,128], index: 1, kind: input, shape index: {}]   ;;  %s794_s2 = inlined_call_operand.vmem [shape: f32[1,128], index: 2, kind: input, shape index: {}]   ;;  %s795_s3 = inlined_call_operand.hbm [shape: f32[128,128], index: 3, kind: input, shape index: {}]   ;;  %s796_s4 = inlined_call_operand.vmem [shape: f32[1,128], index: 4, kind: input, shape index: {}]   ;;  %s797_s5 = inlined_call_operand.hbm [shape: f32[128,128], index: 5, kind: input, shape index: {}]   ;;  %s798_s6 = inlined_call_operand.vmem [shape: f32[1,128], index: 6, kind: input, shape index: {}]   ;;  %s799_s7 = inlined_call_operand.hbm [shape: f32[16,128], index: 7, kind: output, shape index: {}]  }
   0x1   :  { %13 = vsyncpa [#allocation6], 0 }
   0x2   :  { %14 = vsyncpa [#allocation9], 0 }
   0x3   :  { %15 = vsyncpa [#allocation4], 0  ;;  %s702_s24 = smov [#allocation5]   ;;  %s703_s26 = smov [#allocation2]  }
   0x4   :  { %s33_s25 = sshll.u32 %s702_s24, 4  ;;  %s21_s27 = sshll.u32 %s703_s26, 4  ;;  %s34_s25 = int_to_ptr.vmem [resolvable:$true] %s33_s25  ;;  %s22_s27 = int_to_ptr.vmem [resolvable:$true] %s21_s27 }
   0x5   :  { %s602_s28 = scalar_lea.vmem %s34_s25, 2048  ;;  %p607_p1 = scmp.lt.s32.totalorder %s34_s25, %s34_s25 }
   0x6   :  { %p603_p0 = scmp.ne.s32.totalorder %s34_s25, %s602_s28  ;;  %p608_p2 = scmp.lt.s32.totalorder %s602_s28, %s602_s28 }
   0x8   :  { %p609_p3 = por %p608_p2, %p607_p1 }
   0xa   :  { %p610_p4 = pnand %p609_p3, %p603_p0 }
   0xc   :  { %613 = shalt.err (!%p610_p4)
}
   0xd   :  { %s704_s29 = smov 128   ;;  %s705_s30 = smov 8  }
   0xe   :  { %39 = dma.hbm_to_vmem [thread:$0]  %s793_s1, 2048, %s34_s25, [#allocation6], %s704_s29, %s704_s29, %s705_s30  }
   0xf   :  { %s622_s10 = scalar_lea.vmem %s22_s27, 256  ;;  %p627_p6 = scmp.lt.s32.totalorder %s22_s27, %s22_s27 }
  0x10   :  { %p623_p5 = scmp.ne.s32.totalorder %s22_s27, %s622_s10  ;;  %p628_p7 = scmp.lt.s32.totalorder %s622_s10, %s622_s10 }
  0x12   :  { %p629_p8 = por %p628_p7, %p627_p6 }
  0x14   :  { %p630_p9 = pnand %p629_p8, %p623_p5 }
  0x16   :  { %633 = shalt.err (!%p630_p9)
}
  0x17   :  { %27 = dma.hbm_to_vmem [thread:$0]  %s792_s0, 256, %s22_s27, [#allocation3], %s704_s29, %s704_s29, %s705_s30  }
  0x18   :  { %s706_s13 = smov [#allocation7]   ;;  %s707_s15 = smov [#allocation8]  }
  0x19   :  { %s47_s14 = sshll.u32 %s706_s13, 4  ;;  %s61_s16 = sshll.u32 %s707_s15, 4  ;;  %s48_s14 = int_to_ptr.vmem [resolvable:$true] %s47_s14  ;;  %s62_s16 = int_to_ptr.vmem [resolvable:$true] %s61_s16 }
  0x1a   :  { %s642_s1 = scalar_lea.vmem %s48_s14, 2048  ;;  %p647_p11 = scmp.lt.s32.totalorder %s48_s14, %s48_s14 }
  0x1b   :  { %p643_p10 = scmp.ne.s32.totalorder %s48_s14, %s642_s1  ;;  %p648_p12 = scmp.lt.s32.totalorder %s642_s1, %s642_s1 }
  0x1d   :  { %p649_p13 = por %p648_p12, %p647_p11 }
  0x1f   :  { %p650_p0 = pnand %p649_p13, %p643_p10 }
  0x21   :  { %653 = shalt.err (!%p650_p0)
}
  0x22   :  { %53 = dma.hbm_to_vmem [thread:$0]  %s795_s3, 2048, %s48_s14, [#allocation6], %s704_s29, %s704_s29, %s705_s30  }
  0x23   :  { %s662_s0 = scalar_lea.vmem %s62_s16, 2048  ;;  %p667_p2 = scmp.lt.s32.totalorder %s62_s16, %s62_s16 }
  0x24   :  { %p663_p1 = scmp.ne.s32.totalorder %s62_s16, %s662_s0  ;;  %p668_p3 = scmp.lt.s32.totalorder %s662_s0, %s662_s0 }
  0x26   :  { %p669_p4 = por %p668_p3, %p667_p2 }
  0x28   :  { %p670_p5 = pnand %p669_p4, %p663_p1 }
  0x2a   :  { %673 = shalt.err (!%p670_p5)
}
  0x2b   :  { %67 = dma.hbm_to_vmem [thread:$0]  %s797_s5, 2048, %s62_s16, [#allocation9], %s704_s29, %s704_s29, %s705_s30  }
  0x2c   :  { %694 = dma.done.wait [#allocation3], 256  }
  0x2d   :  { %695 = vsyncadd [#allocation3], 4294967040 }
  0x2e   :  { %696 = dma.done.wait [#allocation6], 4096  }
  0x2f   :  { %697 = vsyncadd [#allocation6], 4294963200 }
  0x30   :  { %698 = dma.done.wait [#allocation9], 2048  }
  0x31   :  { %699 = vsyncadd [#allocation9], 4294965248  ;;  %v99_v0 = vld [vmem:[#allocation5 + $0x78] sm:$0xff]  ;;  %v98_v1 = vld [vmem:[#allocation5 + $0x70] sm:$0xff]  ;;  %s708_s24 = smov [#allocation10]  }
  0x32   :  { %474 = vmatprep.subr.mxu0 %v99_v0  ;;  %v97_v2 = vld [vmem:[#allocation5 + $0x68] sm:$0xff]  ;;  %v96_v3 = vld [vmem:[#allocation5 + $0x60] sm:$0xff]  ;;  %v773_v4 = vld [vmem:[#allocation2] sm:$0xff]  ;;  %s401_s25 = sshll.u32 %s708_s24, 4  ;;  %s402_s25 = int_to_ptr.vmem [resolvable:$true] %s401_s25 }
  0x33   :  { %475 = vmatpush3.msra.mxu0 %v99_v0  ;;  %v95_v5 = vld [vmem:[#allocation5 + $0x58] sm:$0xff]  ;;  %506 = vmatprep.mubr.f32.mxu0 %v773_v4  ;;  %v196_v7 = vld [vmem:[#allocation7 + $0x70] sm:$0xff]  ;;  %v195_v9 = vld [vmem:[#allocation7 + $0x68] sm:$0xff]  ;;  %p679_p7 = scmp.lt.s32.totalorder %s402_s25, %s402_s25 }
  0x34   :  { %476 = vmatprep.subr.mxu0 %v98_v1  ;;  %v197_v6 = vld [vmem:[#allocation7 + $0x78] sm:$0xff]  ;;  %v94_v8 = vld [vmem:[#allocation5 + $0x50] sm:$0xff]  ;;  %v93_v10 = vld [vmem:[#allocation5 + $0x48] sm:$0xff]  ;;  %541 = vmatprep.mubr.f32.mxu1 %v773_v4 }
  0x35   :  { %477 = vmatpush3.msra.mxu0 %v98_v1  ;;  %509 = vmatprep.subr.mxu1 %v197_v6  ;;  %v194_v11 = vld [vmem:[#allocation7 + $0x60] sm:$0xff]  ;;  %v193_v13 = vld [vmem:[#allocation7 + $0x58] sm:$0xff]  ;;  %v192_v15 = vld [vmem:[#allocation7 + $0x50] sm:$0xff] }
  0x36   :  { %478 = vmatprep.subr.mxu0 %v97_v2  ;;  %510 = vmatpush3.msra.mxu1 %v197_v6  ;;  %v92_v12 = vld [vmem:[#allocation5 + $0x40] sm:$0xff]  ;;  %v91_v14 = vld [vmem:[#allocation5 + $0x38] sm:$0xff]  ;;  %v90_v16 = vld [vmem:[#allocation5 + $0x30] sm:$0xff] }
  0x37   :  { %479 = vmatpush3.msra.mxu0 %v97_v2  ;;  %511 = vmatprep.subr.mxu1 %v196_v7  ;;  %v191_v17 = vld [vmem:[#allocation7 + $0x48] sm:$0xff]  ;;  %v190_v19 = vld [vmem:[#allocation7 + $0x40] sm:$0xff]  ;;  %v189_v21 = vld [vmem:[#allocation7 + $0x38] sm:$0xff] }
  0x38   :  { %480 = vmatprep.subr.mxu0 %v96_v3  ;;  %512 = vmatpush3.msra.mxu1 %v196_v7  ;;  %v89_v18 = vld [vmem:[#allocation5 + $0x28] sm:$0xff]  ;;  %v88_v20 = vld [vmem:[#allocation5 + $0x20] sm:$0xff]  ;;  %v87_v22 = vld [vmem:[#allocation5 + $0x18] sm:$0xff] }
  0x39   :  { %481 = vmatpush3.msra.mxu0 %v96_v3  ;;  %513 = vmatprep.subr.mxu1 %v195_v9  ;;  %v188_v23 = vld [vmem:[#allocation7 + $0x30] sm:$0xff]  ;;  %v187_v25 = vld [vmem:[#allocation7 + $0x28] sm:$0xff]  ;;  %v186_v27 = vld [vmem:[#allocation7 + $0x20] sm:$0xff] }
  0x3a   :  { %482 = vmatprep.subr.mxu0 %v95_v5  ;;  %514 = vmatpush3.msra.mxu1 %v195_v9  ;;  %v86_v24 = vld [vmem:[#allocation5 + $0x10] sm:$0xff]  ;;  %v85_v26 = vld [vmem:[#allocation5 + $0x8] sm:$0xff]  ;;  %v84_v28 = vld [vmem:[#allocation5] sm:$0xff] }
  0x3b   :  { %483 = vmatpush3.msra.mxu0 %v95_v5  ;;  %515 = vmatprep.subr.mxu1 %v194_v11  ;;  %v185_v29 = vld [vmem:[#allocation7 + $0x18] sm:$0xff]  ;;  %v184_v31 = vld [vmem:[#allocation7 + $0x10] sm:$0xff]  ;;  %v183_v32 = vld [vmem:[#allocation7 + $0x8] sm:$0xff] }
  0x3c   :  { %484 = vmatprep.subr.mxu0 %v94_v8  ;;  %516 = vmatpush3.msra.mxu1 %v194_v11  ;;  %v83_v30 = vld [vmem:[#allocation2 + $0x8] sm:$0xff]  ;;  %v182_v33 = vld [vmem:[#allocation7] sm:$0xff]  ;;  %v310_v35 = vld [vmem:[#allocation8 + $0x70] sm:$0xff] }
  0x3d   :  { %485 = vmatpush3.msra.mxu0 %v94_v8  ;;  %517 = vmatprep.subr.mxu1 %v193_v13  ;;  %v311_v34 = vld [vmem:[#allocation8 + $0x78] sm:$0xff]  ;;  %v309_v36 = vld [vmem:[#allocation8 + $0x68] sm:$0xff]  ;;  %v308_v37 = vld [vmem:[#allocation8 + $0x60] sm:$0xff] }
  0x3e   :  { %486 = vmatprep.subr.mxu0 %v93_v10  ;;  %518 = vmatpush3.msra.mxu1 %v193_v13  ;;  %v307_v38 = vld [vmem:[#allocation8 + $0x58] sm:$0xff]  ;;  %v306_v39 = vld [vmem:[#allocation8 + $0x50] sm:$0xff]  ;;  %v305_v40 = vld [vmem:[#allocation8 + $0x48] sm:$0xff] }
  0x3f   :  { %487 = vmatpush3.msra.mxu0 %v93_v10  ;;  %519 = vmatprep.subr.mxu1 %v192_v15  ;;  %v304_v41 = vld [vmem:[#allocation8 + $0x40] sm:$0xff]  ;;  %v303_v42 = vld [vmem:[#allocation8 + $0x38] sm:$0xff]  ;;  %v302_v43 = vld [vmem:[#allocation8 + $0x30] sm:$0xff] }
  0x40   :  { %488 = vmatprep.subr.mxu0 %v92_v12  ;;  %520 = vmatpush3.msra.mxu1 %v192_v15  ;;  %v301_v44 = vld [vmem:[#allocation8 + $0x28] sm:$0xff]  ;;  %v300_v45 = vld [vmem:[#allocation8 + $0x20] sm:$0xff]  ;;  %v299_v46 = vld [vmem:[#allocation8 + $0x18] sm:$0xff] }
  0x41   :  { %489 = vmatpush3.msra.mxu0 %v92_v12  ;;  %521 = vmatprep.subr.mxu1 %v191_v17  ;;  %v298_v47 = vld [vmem:[#allocation8 + $0x10] sm:$0xff]  ;;  %v297_v48 = vld [vmem:[#allocation8 + $0x8] sm:$0xff]  ;;  %v296_v49 = vld [vmem:[#allocation8] sm:$0xff] }
  0x42   :  { %490 = vmatprep.subr.mxu0 %v91_v14  ;;  %522 = vmatpush3.msra.mxu1 %v191_v17  ;;  %v415_v50 = vld [vmem:[%s794_s2] ss:$0 sm:$0xff] }
  0x43   :  { %491 = vmatpush3.msra.mxu0 %v91_v14  ;;  %523 = vmatprep.subr.mxu1 %v190_v19  ;;  %v416_v62 = vld [vmem:[%s796_s4] ss:$0 sm:$0xff]  ;;  %s674_s4 = scalar_lea.vmem %s402_s25, 256 }
  0x44   :  { %492 = vmatprep.subr.mxu0 %v90_v16  ;;  %524 = vmatpush3.msra.mxu1 %v190_v19  ;;  %v419_v8 = vld [vmem:[%s798_s6] ss:$0 sm:$0xff]  ;;  %p675_p6 = scmp.ne.s32.totalorder %s402_s25, %s674_s4  ;;  %p680_p8 = scmp.lt.s32.totalorder %s674_s4, %s674_s4 }
  0x45   :  { %493 = vmatpush3.msra.mxu0 %v90_v16  ;;  %525 = vmatprep.subr.mxu1 %v189_v21 }
  0x46   :  { %494 = vmatprep.subr.mxu0 %v89_v18  ;;  %526 = vmatpush3.msra.mxu1 %v189_v21  ;;  %p681_p9 = por %p680_p8, %p679_p7 }
  0x47   :  { %495 = vmatpush3.msra.mxu0 %v89_v18  ;;  %527 = vmatprep.subr.mxu1 %v188_v23 }
  0x48   :  { %496 = vmatprep.subr.mxu0 %v88_v20  ;;  %528 = vmatpush3.msra.mxu1 %v188_v23  ;;  %p682_p10 = pnand %p681_p9, %p675_p6 }
  0x49   :  { %497 = vmatpush3.msra.mxu0 %v88_v20  ;;  %529 = vmatprep.subr.mxu1 %v187_v25 }
  0x4a   :  { %498 = vmatprep.subr.mxu0 %v87_v22  ;;  %530 = vmatpush3.msra.mxu1 %v187_v25 }
  0x4b   :  { %499 = vmatpush3.msra.mxu0 %v87_v22  ;;  %531 = vmatprep.subr.mxu1 %v186_v27 }
  0x4c   :  { %500 = vmatprep.subr.mxu0 %v86_v24  ;;  %532 = vmatpush3.msra.mxu1 %v186_v27 }
  0x4d   :  { %501 = vmatpush3.msra.mxu0 %v86_v24  ;;  %533 = vmatprep.subr.mxu1 %v185_v29 }
  0x4e   :  { %502 = vmatprep.subr.mxu0 %v85_v26  ;;  %534 = vmatpush3.msra.mxu1 %v185_v29 }
  0x4f   :  { %503 = vmatpush3.msra.mxu0 %v85_v26  ;;  %535 = vmatprep.subr.mxu1 %v184_v31 }
  0x50   :  { %504 = vmatprep.subr.mxu0 %v84_v28  ;;  %536 = vmatpush3.msra.mxu1 %v184_v31 }
  0x51   :  { %505 = vmatpush3.msra.mxu0 %v84_v28  ;;  %537 = vmatprep.subr.mxu1 %v183_v32 }
  0x52   :  { %507 = vmatmul.mubr.f32.vlgmr.msra.gmra.mxu0 %v83_v30  ;;  %538 = vmatpush3.msra.mxu1 %v183_v32 }
  0x53   :  { %539 = vmatprep.subr.mxu1 %v182_v33  ;;  %544 = vmatprep.subr.mxu0 %v311_v34 }
  0x54   :  { %540 = vmatpush3.msra.mxu1 %v182_v33  ;;  %545 = vmatpush3.msra.mxu0 %v311_v34 }
  0x55   :  { %542 = vmatmul.mubr.f32.vlgmr.msra.gmra.mxu1 %v83_v30  ;;  %546 = vmatprep.subr.mxu0 %v310_v35 }
  0x56   :  { %547 = vmatpush3.msra.mxu0 %v310_v35 }
  0x57   :  { %548 = vmatprep.subr.mxu0 %v309_v36 }
  0x58   :  { %549 = vmatpush3.msra.mxu0 %v309_v36 }
  0x59   :  { %550 = vmatprep.subr.mxu0 %v308_v37 }
  0x5a   :  { %551 = vmatpush3.msra.mxu0 %v308_v37 }
  0x5b   :  { %552 = vmatprep.subr.mxu0 %v307_v38 }
  0x5c   :  { %553 = vmatpush3.msra.mxu0 %v307_v38 }
  0x5d   :  { %554 = vmatprep.subr.mxu0 %v306_v39 }
  0x5e   :  { %555 = vmatpush3.msra.mxu0 %v306_v39 }
  0x5f   :  { %556 = vmatprep.subr.mxu0 %v305_v40 }
  0x60   :  { %557 = vmatpush3.msra.mxu0 %v305_v40 }
  0x61   :  { %558 = vmatprep.subr.mxu0 %v304_v41 }
  0x62   :  { %559 = vmatpush3.msra.mxu0 %v304_v41 }
  0x63   :  { %560 = vmatprep.subr.mxu0 %v303_v42 }
  0x64   :  { %561 = vmatpush3.msra.mxu0 %v303_v42 }
  0x65   :  { %562 = vmatprep.subr.mxu0 %v302_v43 }
  0x66   :  { %563 = vmatpush3.msra.mxu0 %v302_v43 }
  0x67   :  { %564 = vmatprep.subr.mxu0 %v301_v44 }
  0x68   :  { %565 = vmatpush3.msra.mxu0 %v301_v44 }
  0x69   :  { %566 = vmatprep.subr.mxu0 %v300_v45 }
  0x6a   :  { %567 = vmatpush3.msra.mxu0 %v300_v45 }
  0x6b   :  { %568 = vmatprep.subr.mxu0 %v299_v46 }
  0x6c   :  { %569 = vmatpush3.msra.mxu0 %v299_v46 }
  0x6d   :  { %570 = vmatprep.subr.mxu0 %v298_v47 }
  0x6e   :  { %571 = vmatpush3.msra.mxu0 %v298_v47 }
  0x6f   :  { %572 = vmatprep.subr.mxu0 %v297_v48 }
  0x70   :  { %573 = vmatpush3.msra.mxu0 %v297_v48 }
  0x71   :  { %574 = vmatprep.subr.mxu0 %v296_v49 }
  0x72   :  { %575 = vmatpush3.msra.mxu0 %v296_v49 }
 0x112   :  { %v508_v51 = vpop.f32.mrf.mxu0 }
 0x113   :  { %v179_v52 = vadd.f32 %v508_v51, %v415_v50 }
 0x114   :  { %v173_v53 = vpop.f32.mrf.mxu0 }
 0x115   :  { %v418_v54 = vmul.f32 -1.442695, %v179_v52  ;;  %v174_v55 = vadd.f32 %v415_v50, %v173_v53  ;;  %v543_v61 = vpop.f32.mrf.mxu1 }
 0x116   :  { %v277_v3 = vadd.f32 %v543_v61, %v416_v62 }
 0x117   :  { %586 = vpow2.f32 %v418_v54  ;;  %v417_v56 = vmul.f32 -1.442695, %v174_v55  ;;  %v271_v0 = vpop.f32.mrf.mxu1 }
 0x118   :  { %v272_v5 = vadd.f32 %v416_v62, %v271_v0 }
 0x119   :  { %588 = vpow2.f32 %v417_v56 }
 0x124   :  { %v587_v57 = vpop.eup %586 }
 0x125   :  { %v287_v58 = vadd.f32 1.0, %v587_v57 }
 0x126   :  { %v589_v59 = vpop.eup %588 }
 0x127   :  { %590 = vrcp.f32 %v287_v58  ;;  %v286_v60 = vadd.f32 1.0, %v589_v59 }
 0x129   :  { %592 = vrcp.f32 %v286_v60 }
 0x134   :  { %v591_v63 = vpop.eup %590 }
 0x135   :  { %v293_v2 = vmul.f32 %v591_v63, %v179_v52 }
 0x136   :  { %v593_v1 = vpop.eup %592 }
 0x137   :  { %v292_v4 = vmul.f32 %v593_v1, %v174_v55  ;;  %v295_v7 = vmul.f32 %v293_v2, %v277_v3 }
 0x139   :  { %v294_v6 = vmul.f32 %v292_v4, %v272_v5 }
 0x13b   :  { %576 = vmatprep.mubr.f32.mxu0 %v294_v6 }
 0x13c   :  { %577 = vmatmul.mubr.f32.vlgmr.msra.gmra.mxu0 %v295_v7 }
 0x1fc   :  { %v578_v9 = vpop.f32.mrf.mxu0 }
 0x1fd   :  { %v391_v10 = vadd.f32 %v578_v9, %v419_v8 }
 0x1fe   :  { %v385_v11 = vpop.f32.mrf.mxu0 }
 0x1ff   :  { %395 = vst [vmem:[#allocation10 + $0x8] sm:$0xff] %v391_v10  ;;  %v386_v12 = vadd.f32 %v419_v8, %v385_v11 }
 0x201   :  { %394 = vst [vmem:[#allocation10] sm:$0xff] %v386_v12 }
 0x202   :  { %685 = shalt.err (!%p682_p10)
}
 0x203   :  { %407 = dma.vmem_to_hbm [thread:$0]  %s402_s25, 256, %s799_s7, [#allocation4], %s704_s29, %s704_s29, %s705_s30  }
 0x204   :  { %700 = dma.done.wait [#allocation4], 256  }
 0x205   :  { %701 = vsyncadd [#allocation4], 4294967040 }
 0x206   :  { %411 = vsyncpa [#allocation3], 1 }
 0x207   :  { %412 = vsyncpa [#allocation6], 1 }
 0x208   :  { %413 = vsyncpa [#allocation9], 1 }
 0x209   :  { %414 = vsyncpa [#allocation4], 1 }

</bundles_post_ra>
